<compile_context>
chip_gen: v5e
topology: v5e:2x2
jax: 0.10.0
libtpu: 0.0.40
codegen_flags: <defaults>
</compile_context>

<pallas_src>
import jax
import jax.numpy as jnp
from jax.experimental import pallas as pl
from jax.experimental.pallas import tpu as pltpu

_MIB = 1024 * 1024


def _make_kernel(use_mxu: bool, seq_mask: bool, TS: int, S: int):
    """Builds the grid kernel.

    Refs (in order):
      mask_ref : (TB, 1, TS) [MXU path] or (TB, TS, 1) [VPU path], native dtype
      msum_ref : (TB, 1, 1)  f32, precomputed clamped per-row mask count
      hid_ref  : (TB, TS, H) native hidden dtype
      out_ref  : (TB, 1, H)  f32
      acc_ref  : (TB, 1, H)  f32 scratch, persists across sequence tiles
    """

    def kernel(mask_ref, msum_ref, hid_ref, out_ref, acc_ref):
        s = pl.program_id(1)

        @pl.when(s == 0)
        def _init():
            acc_ref[...] = jnp.zeros_like(acc_ref)

        hid = hid_ref[...]
        mask = mask_ref[...]

        if seq_mask:
            # The last sequence tile extends past the true S; the padded rows
            # contain unspecified data.  Zero both the mask AND the hidden
            # rows (zeroing only the mask would let 0 * NaN poison the sum).
            start = s * TS
            hid_valid = (
                start + jax.lax.broadcasted_iota(jnp.int32, (1, TS, 1), 1)
            ) < S
            hid = jnp.where(hid_valid, hid, jnp.zeros_like(hid))
            if use_mxu:
                mask_valid = (
                    start + jax.lax.broadcasted_iota(jnp.int32, (1, 1, TS), 2)
                ) < S
            else:
                mask_valid = hid_valid
            mask = jnp.where(mask_valid, mask, jnp.zeros_like(mask))

        if use_mxu:
            # Low-precision hidden (bf16/f16): contract the sequence axis on
            # the MXU with f32 accumulation.  Exact for a 0/1 mask.
            partial = jnp.einsum(
                "bqs,bsh->bqh",
                mask.astype(hid.dtype),
                hid,
                preferred_element_type=jnp.float32,
            )  # (TB, 1, H) f32
        else:
            # f32 hidden: exact VPU multiply + sublane (XLU) reduce; avoids
            # the 6-pass HIGHEST MXU decomposition (matters on v7x HBM).
            prod = hid * mask.astype(hid.dtype)             # (TB, TS, H) f32
            partial = jnp.sum(prod, axis=1, keepdims=True)  # (TB, 1, H)

        acc_ref[...] += partial

        @pl.when(s == pl.num_programs(1) - 1)
        def _finalize():
            inv = pl.reciprocal(msum_ref[...], approx=False)   # (TB, 1, 1)
            out_ref[...] = (acc_ref[...] * inv).astype(out_ref.dtype)

    return kernel


def _vmem_params():
    """Generation-aware VMEM budgeting (v7x: 64 MiB/TC, v5e/v6e: 128 MiB)."""
    cap = 64 * _MIB
    try:
        cap = pltpu.get_tpu_info().vmem_capacity_bytes
    except Exception:
        pass  # conservative 64 MiB fallback
    if cap >= 128 * _MIB:
        vmem_limit = 96 * _MIB
        hidden_budget = 48 * _MIB                 # double-buffered hidden blocks
    else:
        vmem_limit = min(44 * _MIB, int(cap * 0.7))
        hidden_budget = vmem_limit - 4 * _MIB     # headroom: mask/out/acc/internal
    return vmem_limit, hidden_budget


def _choose_tiles(B, S, H, itemsize, hidden_budget):
    """Pick (TB, TS).

    TB divides B and, whenever B >= 2, is <= B//2 so the batch ("parallel")
    grid axis has >= 2 programs (keeps both v7x TensorCores busy; harmless on
    single-TC v5e/v6e).  TS is a multiple of 128 (or S itself when S <= 128)
    chosen so the double-buffered hidden block fits the budget.
    """
    max_block = max(hidden_budget // 2, 1)        # one of the two pipeline buffers
    row_bytes = max(H * itemsize, 1)

    divisors = sorted((d for d in range(1, B + 1) if B % d == 0), reverse=True)
    if B >= 2:
        candidates = [d for d in divisors if d <= B // 2] or divisors
    else:
        candidates = divisors

    def ts_for(tb):
        budget_rows = max_block // (tb * row_bytes)
        if S <= 128:
            return S if budget_rows >= S else 0
        ts = min(budget_rows, S + (-S) % 128)     # never exceed S rounded up to 128
        return (ts // 128) * 128

    for tb in candidates:
        ts = ts_for(tb)
        if ts >= min(S, 128):
            return tb, ts

    # TODO(synk): tile the hidden dimension too for H so large that even a
    # (1, 128, H) block exceeds the VMEM budget; fall back to minimal tiles.
    return candidates[-1], (S if S <= 128 else 128)


@jax.jit
def mean_pooling(last_hidden_state: jax.Array, attention_mask: jax.Array) -> jax.Array:
    """Masked mean pooling over the sequence dimension.

    last_hidden_state: [B, S, H]  (any float dtype; streamed in native dtype)
    attention_mask:    [B, S]     (0/1 mask, any dtype)
    returns:           [B, H]     float32
    """
    B, S, H = last_hidden_state.shape
    hid = last_hidden_state
    if attention_mask.dtype == jnp.bool_:
        attention_mask = attention_mask.astype(jnp.int32)

    use_mxu = hid.dtype != jnp.float32

    # Per-row clamped mask count computed once here (tiny XLA reduce); only
    # the divide stays in the kernel finalize.
    sum_mask = jnp.maximum(
        jnp.sum(attention_mask.astype(jnp.float32), axis=1), jnp.float32(1e-9)
    ).reshape(B, 1, 1)

    vmem_limit, hidden_budget = _vmem_params()
    itemsize = jnp.dtype(hid.dtype).itemsize
    TB, TS = _choose_tiles(B, S, H, itemsize, hidden_budget)
    grid = (B // TB, pl.cdiv(S, TS))
    seq_mask = (S % TS) != 0

    if use_mxu:
        mask_in = attention_mask.reshape(B, 1, S)   # lane layout for the MXU einsum
        mask_spec = pl.BlockSpec((TB, 1, TS), lambda b, s: (b, 0, s))
    else:
        mask_in = attention_mask.reshape(B, S, 1)   # sublane layout for the VPU path
        mask_spec = pl.BlockSpec((TB, TS, 1), lambda b, s: (b, s, 0))

    cost = pl.CostEstimate(
        flops=2 * B * S * H,
        transcendentals=0,
        bytes_accessed=(B * S * H * itemsize
                        + B * S * jnp.dtype(attention_mask.dtype).itemsize
                        + B * H * 4 + B * 4),
    )

    out3 = pl.pallas_call(
        _make_kernel(use_mxu, seq_mask, TS, S),
        out_shape=jax.ShapeDtypeStruct((B, 1, H), jnp.float32),
        grid_spec=pltpu.PrefetchScalarGridSpec(
            num_scalar_prefetch=0,
            grid=grid,
            in_specs=[
                mask_spec,
                pl.BlockSpec((TB, 1, 1), lambda b, s: (b, 0, 0)),    # sum_mask
                pl.BlockSpec((TB, TS, H), lambda b, s: (b, s, 0)),   # hidden
            ],
            out_specs=pl.BlockSpec((TB, 1, H), lambda b, s: (b, 0, 0)),
            scratch_shapes=[pltpu.VMEM((TB, 1, H), jnp.float32)],    # f32 accumulator
        ),
        compiler_params=pltpu.CompilerParams(
            dimension_semantics=("parallel", "arbitrary"),
            vmem_limit_bytes=vmem_limit,
        ),
        cost_estimate=cost,
    )(mask_in, sum_mask, hid)

    return out3.reshape(B, H)


def _reference(last_hidden_state, attention_mask):
    hid = last_hidden_state.astype(jnp.float32)
    mask = attention_mask.astype(jnp.float32)[..., None]
    sum_emb = jnp.sum(hid * mask, axis=1)
    sum_mask = jnp.maximum(jnp.sum(mask, axis=1), jnp.float32(1e-9))
    return sum_emb / sum_mask


if __name__ == "__main__":
    key = jax.random.PRNGKey(0)
    k1, k2, k3 = jax.random.split(key, 3)

    def _check(hid, mask, label):
        out = jax.block_until_ready(mean_pooling(hid, mask))
        ref = _reference(hid, mask)
        assert out.shape == ref.shape, f"shape mismatch ({label})"
        assert out.dtype == jnp.float32, f"dtype mismatch ({label})"
        assert jnp.allclose(out, ref, atol=1e-5, rtol=1e-5), f"value mismatch ({label})"

    # Case 1: bf16 hidden (MXU einsum path), spec-sized small shapes.
    B, S, H = 2, 8, 32
    hid_bf16 = jax.random.normal(k1, (B, S, H), dtype=jnp.bfloat16)
    lengths = jnp.array([6, 3], dtype=jnp.int32)
    mask = (jnp.arange(S)[None, :] < lengths[:, None]).astype(jnp.int32)
    _check(hid_bf16, mask, "bf16")

    # Case 2: f32 hidden (exact VPU multiply + reduce path).
    hid_f32 = jax.random.normal(k2, (B, S, H), dtype=jnp.float32)
    _check(hid_f32, mask, "f32")

    # Case 3: sequence length not a multiple of the tile -> partial-tile masking.
    S2, H2 = 200, 128
    hid2 = jax.random.normal(k3, (B, S2, H2), dtype=jnp.bfloat16)
    lengths2 = jnp.array([137, 45], dtype=jnp.int32)
    mask2 = (jnp.arange(S2)[None, :] < lengths2[:, None]).astype(jnp.int32)
    _check(hid2, mask2, "partial-tile")

    print("KERNEL_OK")
</pallas_src>

<mosaic_0001>
module attributes {stable_mosaic.version = 11 : i64} {
  func.func @kernel(%arg0: i32, %arg1: i32, %arg2: memref<1x1x8xi32, #tpu.memory_space<vmem>>, %arg3: memref<1x1x1xf32, #tpu.memory_space<vmem>>, %arg4: memref<1x8x32xbf16, #tpu.memory_space<vmem>>, %arg5: memref<1x1x32xf32, #tpu.memory_space<vmem>>, %arg6: memref<1x1x32xf32, #tpu.memory_space<vmem>>) attributes {dimension_semantics = [#tpu.dimension_semantics<parallel>, #tpu.dimension_semantics<arbitrary>], iteration_bounds = array<i64: 2, 1>, scalar_prefetch = 0 : i64, scratch_operands = 1 : i64, tpu.core_type = #tpu.core_type<tc>, window_params = [{transform_indices = @transform_0, window_bounds = array<i64: 1, 1, 8>}, {transform_indices = @transform_1, window_bounds = array<i64: 1, 1, 1>}, {transform_indices = @transform_2, window_bounds = array<i64: 1, 8, 32>}, {transform_indices = @transform_3, window_bounds = array<i64: 1, 1, 32>}]} {
    %c0_i32 = arith.constant 0 : i32
    %0 = arith.cmpi eq, %arg1, %c0_i32 : i32
    %1 = arith.extui %0 : i1 to i32
    %c0_i32_0 = arith.constant 0 : i32
    %2 = arith.cmpi ne, %1, %c0_i32_0 : i32
    scf.if %2 {
      %cst_14 = arith.constant 0.000000e+00 : f32
      %13 = vector.broadcast %cst_14 : f32 to vector<1x1x32xf32>
      %c0_15 = arith.constant 0 : index
      %c0_16 = arith.constant 0 : index
      %c0_17 = arith.constant 0 : index
      %14 = vector.load %arg6[%c0_15, %c0_16, %c0_17] : memref<1x1x32xf32, #tpu.memory_space<vmem>>, vector<1x1x32xf32>
      tpu.vector_store %arg6[%c0_15, %c0_16, %c0_17], %13 {strides = array<i32>} : memref<1x1x32xf32, #tpu.memory_space<vmem>>, vector<1x1x32xf32>,
    } else {
    }
    %c0 = arith.constant 0 : index
    %c0_1 = arith.constant 0 : index
    %c0_2 = arith.constant 0 : index
    %3 = vector.load %arg4[%c0, %c0_1, %c0_2] : memref<1x8x32xbf16, #tpu.memory_space<vmem>>, vector<1x8x32xbf16>
    %c0_3 = arith.constant 0 : index
    %c0_4 = arith.constant 0 : index
    %c0_5 = arith.constant 0 : index
    %4 = vector.load %arg2[%c0_3, %c0_4, %c0_5] : memref<1x1x8xi32, #tpu.memory_space<vmem>>, vector<1x1x8xi32>
    %5 = arith.sitofp %4 : vector<1x1x8xi32> to vector<1x1x8xbf16>
    "tpu.trace_start"() <{level = 10 : i32, message = "bqs,bsh->bqh"}> : () -> ()
    %cst = arith.constant dense<0.000000e+00> : vector<1x1x32xf32>
    %6 = tpu.matmul %5, %3, %cst {dimension_numbers = #tpu.dot_dimension_numbers<[2], [1], [1], [2], [0, 0, 0, 1, 1, 2], [0], [0]>} : vector<1x1x8xbf16>, vector<1x8x32xbf16>, vector<1x1x32xf32> -> vector<1x1x32xf32>
    "tpu.trace_stop"() : () -> ()
    %c0_6 = arith.constant 0 : index
    %c0_7 = arith.constant 0 : index
    %c0_8 = arith.constant 0 : index
    %7 = vector.load %arg6[%c0_6, %c0_7, %c0_8] : memref<1x1x32xf32, #tpu.memory_space<vmem>>, vector<1x1x32xf32>
    %8 = arith.addf %7, %6 : vector<1x1x32xf32>
    %c0_9 = arith.constant 0 : index
    %c0_10 = arith.constant 0 : index
    %c0_11 = arith.constant 0 : index
    %9 = vector.load %arg6[%c0_9, %c0_10, %c0_11] : memref<1x1x32xf32, #tpu.memory_space<vmem>>, vector<1x1x32xf32>
    tpu.vector_store %arg6[%c0_9, %c0_10, %c0_11], %8 {strides = array<i32>} : memref<1x1x32xf32, #tpu.memory_space<vmem>>, vector<1x1x32xf32>,
    %c0_i32_12 = arith.constant 0 : i32
    %10 = arith.cmpi eq, %arg1, %c0_i32_12 : i32
    %11 = arith.extui %10 : i1 to i32
    %c0_i32_13 = arith.constant 0 : i32
    %12 = arith.cmpi ne, %11, %c0_i32_13 : i32
    scf.if %12 {
      %c0_14 = arith.constant 0 : index
      %c0_15 = arith.constant 0 : index
      %c0_16 = arith.constant 0 : index
      %13 = vector.load %arg3[%c0_14, %c0_15, %c0_16] : memref<1x1x1xf32, #tpu.memory_space<vmem>>, vector<1x1x1xf32>
      %14 = tpu.reciprocal %13 : vector<1x1x1xf32> -> vector<1x1x1xf32>
      %c0_17 = arith.constant 0 : index
      %c0_18 = arith.constant 0 : index
      %c0_19 = arith.constant 0 : index
      %15 = vector.load %arg6[%c0_17, %c0_18, %c0_19] : memref<1x1x32xf32, #tpu.memory_space<vmem>>, vector<1x1x32xf32>
      %16 = vector.broadcast %14 : vector<1x1x1xf32> to vector<1x1x32xf32>
      %17 = arith.mulf %15, %16 : vector<1x1x32xf32>
      %c0_20 = arith.constant 0 : index
      %c0_21 = arith.constant 0 : index
      %c0_22 = arith.constant 0 : index
      %18 = vector.load %arg5[%c0_20, %c0_21, %c0_22] : memref<1x1x32xf32, #tpu.memory_space<vmem>>, vector<1x1x32xf32>
      tpu.vector_store %arg5[%c0_20, %c0_21, %c0_22], %17 {strides = array<i32>} : memref<1x1x32xf32, #tpu.memory_space<vmem>>, vector<1x1x32xf32>,
    } else {
    }
    return
  }
  func.func @transform_0(%arg0: i32, %arg1: i32) -> (i32, i32, i32) {
    %c0_i32 = arith.constant 0 : i32
    %c0_i32_0 = arith.constant 0 : i32
    return %arg0, %c0_i32, %arg1 : i32, i32, i32
  }
  func.func @transform_1(%arg0: i32, %arg1: i32) -> (i32, i32, i32) {
    %c0_i32 = arith.constant 0 : i32
    %c0_i32_0 = arith.constant 0 : i32
    %c0_i32_1 = arith.constant 0 : i32
    return %arg0, %c0_i32, %c0_i32_0 : i32, i32, i32
  }
  func.func @transform_2(%arg0: i32, %arg1: i32) -> (i32, i32, i32) {
    %c0_i32 = arith.constant 0 : i32
    %c0_i32_0 = arith.constant 0 : i32
    return %arg0, %arg1, %c0_i32 : i32, i32, i32
  }
  func.func @transform_3(%arg0: i32, %arg1: i32) -> (i32, i32, i32) {
    %c0_i32 = arith.constant 0 : i32
    %c0_i32_0 = arith.constant 0 : i32
    %c0_i32_1 = arith.constant 0 : i32
    return %arg0, %c0_i32, %c0_i32_0 : i32, i32, i32
  }
}

</mosaic_0001>

<bundles_post_ra>
// kernel: mean_pooling.1
= control target key start
LH: loop header
LB: loop body
LE: loop exit
PB: predicated region body
PF: predicated region fallthrough
CT: control target
= control target key end

     0   :  { %8 = vsyncpa [#allocation4], 0  ;;  %s755_s0 = inlined_call_operand.hbm [shape: s32[2,1,8], index: 0, kind: input, shape index: {}]   ;;  %s756_s1 = inlined_call_operand.vmem [shape: f32[2,1,1], index: 1, kind: input, shape index: {}]   ;;  %s757_s2 = inlined_call_operand.vmem [shape: bf16[2,8,32], index: 2, kind: input, shape index: {}]   ;;  %s758_s3 = inlined_call_operand.hbm [shape: f32[2,1,32], index: 3, kind: output, shape index: {}]  }
   0x1   :  { %10 = vsyncpa [#allocation4 + $0x1], 0 }
   0x2   :  { %11 = vsyncpa [#allocation5], 0 }
   0x3   :  { %13 = vsyncpa [#allocation5 + $0x1], 0  ;;  %s623_s12 = smov 0   ;;  %s625_s13 = smov 0  }
   0x4   :  { %s627_s14 = smov 0   ;;  %s629_s15 = smov 0  }
   0x5   :  { %s631_s16 = smov 0   ;;  %s633_s17 = smov 0  }
   0x6 LB: > { %s411_s18 = sadd.s32 4294967295, %s599_s17   ;;  %s412_s19 = sadd.s32 4294967294, %s599_s17   ;;  %s599_s17 = sphi %s633_s17, %s19_s17   ;;  %s595_s16 = sphi %s631_s16, %s767_s16   ;;  %s591_s15 = sphi %s629_s15, %s766_s15   ;;  %s587_s14 = sphi %s627_s14, %s765_s14   ;;  %s583_s13 = sphi %s625_s13, %s764_s13   ;;  %s579_s12 = sphi %s623_s12, %s763_s12  }
   0x7   : > { %s31_s20 = sadd.s32 1, %s595_s16  ;;  %s40_s21 = sadd.s32 1, %s587_s14 }
   0x8   : > { %p33_p0 = scmp.ge.s32.totalorder %s31_s20, 2  ;;  %p47_p1 = scmp.ne.s32.totalorder %s587_s14, %s583_s13 }
   0x9   : > { %p48_p2 = scmp.eq.s32.totalorder %s599_s17, 0  ;;  %p53_p3 = scmp.ne.s32.totalorder %s583_s13, %s579_s12 }
   0xa   : > { %s769_s20 = smov (%p33_p0, %s31_s20), 0  ;;  %p54_p5 = scmp.eq.s32.totalorder %s411_s18, 0 }
   0xb   : > { %p664_p4 = por %p48_p2, %p47_p1  ;;  %s35_s23 = ssub.s32 %s595_s16, %s769_s20 }
   0xc   : > { %p131_p6 = scmp.eq.s32.totalorder %s411_s18, 1  ;;  %p38_p7 = scmp.eq.s32.totalorder %s35_s23, 0 }
   0xd   : > { %p670_p8 = por %p54_p5, %p53_p3  ;;  %p137_p10 = scmp.eq.s32.totalorder %s412_s19, 1 }
   0xe   : > { %p674_p9 = por %p131_p6, %p47_p1  ;;  %p414_p12 = scmp.ge.s32.totalorder %s599_s17, 2 }
   0xf   : > { %s679_s26 = scalar_select %p38_p7, %s587_s14, %s40_s21  }
  0x10   : > { %p681_p11 = por %p137_p10, %p53_p3  ;;  %p432_p13 = scmp.lt.s32.totalorder %s599_s17, 2 }
  0x11   : > { %s157_s28 = sand.u32 1, %s587_s14   ;;  %s164_s4 = scalar_lea.hbm %s755_s0, %s595_s16 }
  0x12   : > { %s160_s5 = scalar_lea.vmem [#allocation3], %s157_s28  ;;  %s166_s7 = sshll.u32 %s164_s4, 4  ;;  %s167_s7 = int_to_ptr.hbm [resolvable:$true] %s166_s7 }
  0x13   : > { %s168_s6 = sshll.u32 %s160_s5, 4  ;;  %p425_p0 = pnand %p432_p13, %p664_p4  ;;  %s169_s6 = int_to_ptr.vmem [resolvable:$true] %s168_s6 }
  0x14   : > { %p415_p1 = scmp.ge.s32.totalorder %s599_s17, 1  ;;  %p189_p2 = scmp.lt.s32.totalorder %s599_s17, 3 }
  0x15   : > { %s158_s8 = scalar_lea.sflag [#allocation4], %s157_s28 }
  0x16   : > { %427 = dma.hbm_to_vmem [thread:$0]  (!%p425_p0), %s167_s7, 16, %s169_s6, %s158_s8  }
  0x17   : > { %p190_p3 = pnand %p415_p1, %p189_p2 }
  0x18   : > { %s697_s9 = sand.u32 (!%p190_p3), 1, %s583_s13  }
  0x19   : > { %193 = sbr.rel (%p190_p3) target bundleno = 183 (0xb7), region = 32  ;;  %s196_s10 = scalar_lea.sflag (!%p190_p3), [#allocation4], %s697_s9 }
  0x1a   : > { %s198_s11 = scalar_lea.vmem (!%p190_p3), [#allocation3], %s697_s9 }
  0x1e   : > { %570 = dma.done.wait (%p670_p8), %s196_s10, 16  }
  0x1f   : > { %572 = vsyncadd (%p670_p8), %s196_s10, 4294967280  ;;  %p230_p4 = scmp.lt.s32.totalorder %s591_s15, 1  ;;  %vm245_vm0 = vcmask 253952   ;;  %v601_v0 = vmov 0   ;;  %v602_v1 = vmov 0.0   ;;  %vm255_vm1 = vcmask 1043456   ;;  %s312_s5 = scalar_lea.hbm %s758_s3, %s591_s15 }
  0x20   : > { %484 = vset.pattern.permute.xlu0 %v601_v0  ;;  %246 = vst.msk [vmem:[#allocation2] sm:$0x1] %vm245_vm0, %v602_v1  ;;  %v248_v4 = vld [vmem:[%s198_s11] sm:$0x1]  ;;  %vm251_vm2 = vcmask 64512   ;;  %s229_s6 = scalar_lea.vmem [#allocation6], %s697_s9 }
  0x21   : > { %s231_s18 = scalar_select %p230_p4, %s591_s15, 1  ;;  %v249_v6 = vcvt.s32.f32 %v248_v4 }
  0x22   : > { %s314_s7 = sshll.u32 %s229_s6, 4  ;;  %s316_s8 = sshll.u32 %s312_s5, 4  ;;  %s315_s7 = int_to_ptr.vmem [resolvable:$true] %s314_s7  ;;  %s317_s8 = int_to_ptr.hbm [resolvable:$true] %s316_s8 }
  0x23   : > { %s232_s22 = scalar_lea.vmem %s756_s1, %s231_s18  ;;  %s416_s23 = sshll.u32 %s231_s18, 2  ;;  %v250_v7 = vpack.c.bf16 %v249_v6, %v249_v6 }
  0x24   : > { %s239_s24 = scalar_lea.vmem %s757_s2, %s416_s23  ;;  %v279_v3 = vld [vmem:[%s232_s22] sm:$0x1]  ;;  %s304_s10 = scalar_lea.sflag [#allocation5], %s697_s9 }
  0x25   : > { %v247_v2 = vld [vmem:[%s239_s24] sm:$0xf]  ;;  %485 = vrcp.f32 %v279_v3  ;;  %v291_v10 = vand.u32 2147483648, %v279_v3  ;;  %vm285_vm3 = vweird.f32 %v279_v3  ;;  %v289_v12 = vand.u32 2147483647, %v279_v3  ;;  %s531_s11 = sshra.s32 %s317_s8, 4  ;;  %s532_s11 = int_to_ptr.hbm [resolvable:$true] %s531_s11 }
  0x26   : > { %v257_v5 = vsel %vm255_vm1, %v247_v2, 0  ;;  %s533_s18 = scalar_lea.hbm %s532_s11, 1  ;;  %s537_s21 = scalar_lea.hbm %s758_s3, 2 }
  0x27   : > { %266 = vmatpush.bf16.msra.mxu0 %v257_v5  ;;  %v292_v14 = vor.u32 1.1754944e-38, %v291_v10  ;;  %vm290_vm6 = vcmp.eq.f32.partialorder %v289_v12, 8.507059e+37  ;;  %v272_v18 = vld [vmem:[#allocation2] sm:$0x1]  ;;  %p534_p5 = scmp.ne.s32.totalorder %s532_s11, %s533_s18  ;;  %p538_p8 = scmp.lt.s32.totalorder %s532_s11, %s758_s3 }
  0x28   : > { %p539_p10 = scmp.lt.s32.totalorder %s537_s21, %s533_s18 }
  0x29   : > { %p535_p6 = pnand %p534_p5, %p674_p9 }
  0x2a   : > { %417 = vmatmul.msk.bf16.vlgmr.msra.gmra.mxu0 %vm251_vm2, %v250_v7  ;;  %p540_p13 = por %p539_p10, %p538_p8 }
  0x2b   : > { %v486_v8 = vpop.eup %485  ;;  %p536_p7 = pneg %p535_p6 }
  0x2c   : > { %v281_v9 = vmul.f32 %v486_v8, %v279_v3  ;;  %vm286_vm4 = vweird.f32 %v486_v8 }
  0x2d   : > { %vm287_vm5 = vmor %vm285_vm3, %vm286_vm4  ;;  %p541_p0 = pnand %p540_p13, %p536_p7 }
  0x2e   : > { %v282_v11 = vsub.f32 1.0, %v281_v9 }
  0x30   : > { %v283_v13 = vmul.f32 %v486_v8, %v282_v11 }
  0x32   : > { %v284_v15 = vadd.f32 %v486_v8, %v283_v13 }
  0x34   : > { %v288_v16 = vsel %vm287_vm5, %v486_v8, %v284_v15 }
  0x35   : > { %v293_v17 = vsel %vm290_vm6, %v292_v14, %v288_v16 }
  0x36   : > { %297 = vperm.xlu0 %484, %v293_v17  }
  0xa7   : > { %v268_v19 = vpop.f32.mrf.mxu0 }
  0xa8   : > { %v273_v20 = vadd.f32 %v272_v18, %v268_v19  ;;  %v298_v21 = vpop.permute.xlu0 %297 }
  0xa9   : > { %v300_v22 = vperm.slane %v298_v21, 0 }
  0xaa   : > { %275 = vst.msk [vmem:[#allocation2] sm:$0x1] %vm245_vm0, %v273_v20 }
  0xaf   : > { %v270_v23 = vpop.f32.mrf.mxu0 }
  0xb1   : > { %v294_v24 = vld [vmem:[#allocation2] sm:$0x1] }
  0xb2   : > { %v301_v25 = vmul.f32 %v300_v22, %v294_v24 }
  0xb4   : > { %302 = vst.msk [vmem:[%s229_s6] sm:$0x1] %vm245_vm0, %v301_v25 }
  0xb5   : > { %544 = shalt.err (!%p541_p0)
}
  0xb6   : > { %422 = dma.vmem_to_hbm [thread:$0]  (%p674_p9), %s315_s7, 16, %s317_s8, %s304_s10  }
  0xb7 PF: > { %s328_s9 = sand.u32 1, %s579_s12   ;;  %p429_p1 = pnand %p414_p12, %p681_p11 }
  0xb8   : > { %s329_s28 = scalar_lea.sflag [#allocation5], %s328_s9 }
  0xb9   : > { %p430_p2 = pneg %p429_p1 }
  0xbb   : > { %574 = dma.done.wait (%p430_p2), %s329_s28, 16  }
  0xbc   : > { %576 = vsyncadd (%p430_p2), %s329_s28, 4294967280  ;;  %s19_s17 = sadd.s32 1, %s599_s17   ;;  %s763_s12 = smov %s583_s13 }
  0xbd   : > { %p16_p3 = scmp.ge.s32.totalorder %s19_s17, 4   ;;  %s764_s13 = smov %s587_s14 }
  0xbe   : > { %s765_s14 = smov %s679_s26  ;;  %s766_s15 = smov %s595_s16 }
  0xbf   : > { %s767_s16 = smov %s769_s20  ;;  %18 = sbr.rel (!%p16_p3) target bundleno = 6 (0x6), region = 91 }
  0xc4   :  { %334 = vsyncpa [#allocation4], 1 }
  0xc5   :  { %336 = vsyncpa [#allocation4 + $0x1], 1 }
  0xc6   :  { %337 = vsyncpa [#allocation5], 1 }
  0xc7   :  { %339 = vsyncpa [#allocation5 + $0x1], 1 }

</bundles_post_ra>
